<compile_context>
chip_gen: v6e
topology: v6e:2x2x1
jax: 0.10.0
libtpu: 0.0.40
codegen_flags: <defaults>
</compile_context>

<pallas_src>
import jax
import jax.numpy as jnp
from jax.experimental import pallas as pl
from jax.experimental.pallas import tpu as pltpu


def _ceil_to(x, m):
    return ((x + m - 1) // m) * m


def linear_kernel(x_ref, wt_ref, b_ref, o_ref):
    # y = x @ W^T + b, computed as IN (=3) VPU broadcast-FMAs, f32 accumulation.
    # x_ref : (TM, IN)   activations tile
    # wt_ref: (IN, OUT)  pre-transposed weight (W^T), f32
    # b_ref : (1, OUT)   bias, f32
    # o_ref : (TM, OUT)  output tile in the caller's dtype
    x = x_ref[...].astype(jnp.float32)                       # (TM, IN)
    acc = jnp.broadcast_to(b_ref[...].astype(jnp.float32), o_ref.shape)
    for i in range(x.shape[1]):                              # static unroll: 3 FMAs
        acc = acc + x[:, i:i + 1] * wt_ref[i:i + 1, :].astype(jnp.float32)
    o_ref[...] = acc.astype(o_ref.dtype)


def softmax_classifier_forward(x, weight, bias, *, max_tile=4096):
    """Pallas forward for SoftmaxClassifierModel: returns Linear(3, 3) logits."""
    B, IN = x.shape
    OUT = weight.shape[0]

    # One-time (tiny) layout prep: W^T and bias as f32 2-D arrays.
    w_t = weight.T.astype(jnp.float32)                       # (IN, OUT)
    b_p = bias.astype(jnp.float32).reshape(1, OUT)           # (1, OUT)

    # Batch tile: multiple of 8 sublanes, capped at max_tile. No padding of x —
    # the ragged last block is handled by Pallas (OOB writes are masked).
    TM = min(max_tile, _ceil_to(B, 8))
    # For mid-size batches that would otherwise be a 1-step grid, split into 2
    # steps so the "parallel" axis shards across v7x's 2 TensorCores; the extra
    # ~0.35 us step cost is negligible on single-TC v5e/v6e.
    if B >= 1024 and pl.cdiv(B, TM) < 2:
        TM = _ceil_to(pl.cdiv(B, 2), 8)
    grid = (pl.cdiv(B, TM),)

    out = pl.pallas_call(
        linear_kernel,
        out_shape=jax.ShapeDtypeStruct((B, OUT), x.dtype),
        grid=grid,
        in_specs=[
            pl.BlockSpec((TM, IN), lambda i: (i, 0)),        # activations, tiled over batch
            pl.BlockSpec((IN, OUT), lambda i: (0, 0)),       # W^T, resident
            pl.BlockSpec((1, OUT), lambda i: (0, 0)),        # bias, resident
        ],
        out_specs=pl.BlockSpec((TM, OUT), lambda i: (i, 0)),
        compiler_params=pltpu.CompilerParams(
            dimension_semantics=("parallel",),               # shards batch across v7x's 2 TCs
        ),
    )(x, w_t, b_p)
    return out


if __name__ == "__main__":
    key = jax.random.PRNGKey(0)
    kx, kw, kb = jax.random.split(key, 3)

    # nn.Linear(3, 3): weight (3, 3), bias (3,)
    in_features, out_features = 3, 3
    bound = 1.0 / (in_features ** 0.5)
    weight = jax.random.uniform(kw, (out_features, in_features),
                                dtype=jnp.float32, minval=-bound, maxval=bound)
    bias = jax.random.uniform(kb, (out_features,),
                              dtype=jnp.float32, minval=-bound, maxval=bound)

    # Primary small check (batch=8) + a ragged-batch check (batch=37) to
    # exercise the partial last block with no wrapper-side padding.
    for batch in (8, 37):
        x = jax.random.normal(kx, (batch, in_features), dtype=jnp.float32)
        out = softmax_classifier_forward(x, weight, bias)
        jax.block_until_ready(out)
        ref = x @ weight.T + bias                            # exact nn.Linear semantics
        assert out.shape == (batch, out_features)
        assert out.dtype == x.dtype
        assert jnp.allclose(out, ref, atol=1e-5, rtol=1e-5)

    print("KERNEL_OK")
</pallas_src>

<mosaic_0001>
module attributes {stable_mosaic.version = 11 : i64} {
  func.func @linear_kernel(%arg0: i32, %arg1: memref<8x3xf32, #tpu.memory_space<vmem>>, %arg2: memref<3x3xf32, #tpu.memory_space<vmem>>, %arg3: memref<1x3xf32, #tpu.memory_space<vmem>>, %arg4: memref<8x3xf32, #tpu.memory_space<vmem>>) attributes {dimension_semantics = [#tpu.dimension_semantics<parallel>], iteration_bounds = array<i64: 1>, scalar_prefetch = 0 : i64, scratch_operands = 0 : i64, tpu.core_type = #tpu.core_type<tc>, window_params = [{transform_indices = @transform_0, window_bounds = array<i64: 8, 3>}, {pipeline_mode = #tpu.pipeline_mode<synchronous>, transform_indices = @transform_1, window_bounds = array<i64: 3, 3>}, {pipeline_mode = #tpu.pipeline_mode<synchronous>, transform_indices = @transform_2, window_bounds = array<i64: 1, 3>}, {transform_indices = @transform_3, window_bounds = array<i64: 8, 3>}]} {
    %c0 = arith.constant 0 : index
    %c0_0 = arith.constant 0 : index
    %0 = vector.load %arg1[%c0, %c0_0] : memref<8x3xf32, #tpu.memory_space<vmem>>, vector<8x3xf32>
    %c0_1 = arith.constant 0 : index
    %c0_2 = arith.constant 0 : index
    %1 = vector.load %arg3[%c0_1, %c0_2] : memref<1x3xf32, #tpu.memory_space<vmem>>, vector<1x3xf32>
    %2 = vector.shape_cast %1 : vector<1x3xf32> to vector<1x3xf32>
    %3 = vector.broadcast %2 : vector<1x3xf32> to vector<8x3xf32>
    %4 = vector.extract_strided_slice %0 {offsets = [0, 0], sizes = [8, 1], strides = [1, 1]} : vector<8x3xf32> to vector<8x1xf32>
    %c0_3 = arith.constant 0 : index
    %c0_4 = arith.constant 0 : index
    %5 = vector.load %arg2[%c0_3, %c0_4] : memref<3x3xf32, #tpu.memory_space<vmem>>, vector<1x3xf32>
    %6 = vector.broadcast %4 : vector<8x1xf32> to vector<8x3xf32>
    %7 = vector.broadcast %5 : vector<1x3xf32> to vector<8x3xf32>
    %8 = arith.mulf %6, %7 : vector<8x3xf32>
    %9 = arith.addf %3, %8 : vector<8x3xf32>
    %10 = vector.extract_strided_slice %0 {offsets = [0, 1], sizes = [8, 1], strides = [1, 1]} : vector<8x3xf32> to vector<8x1xf32>
    %c1 = arith.constant 1 : index
    %c0_5 = arith.constant 0 : index
    %11 = vector.load %arg2[%c1, %c0_5] : memref<3x3xf32, #tpu.memory_space<vmem>>, vector<1x3xf32>
    %12 = vector.broadcast %10 : vector<8x1xf32> to vector<8x3xf32>
    %13 = vector.broadcast %11 : vector<1x3xf32> to vector<8x3xf32>
    %14 = arith.mulf %12, %13 : vector<8x3xf32>
    %15 = arith.addf %9, %14 : vector<8x3xf32>
    %16 = vector.extract_strided_slice %0 {offsets = [0, 2], sizes = [8, 1], strides = [1, 1]} : vector<8x3xf32> to vector<8x1xf32>
    %c2 = arith.constant 2 : index
    %c0_6 = arith.constant 0 : index
    %17 = vector.load %arg2[%c2, %c0_6] : memref<3x3xf32, #tpu.memory_space<vmem>>, vector<1x3xf32>
    %18 = vector.broadcast %16 : vector<8x1xf32> to vector<8x3xf32>
    %19 = vector.broadcast %17 : vector<1x3xf32> to vector<8x3xf32>
    %20 = arith.mulf %18, %19 : vector<8x3xf32>
    %21 = arith.addf %15, %20 : vector<8x3xf32>
    %c0_7 = arith.constant 0 : index
    %c0_8 = arith.constant 0 : index
    %22 = vector.load %arg4[%c0_7, %c0_8] : memref<8x3xf32, #tpu.memory_space<vmem>>, vector<8x3xf32>
    tpu.vector_store %arg4[%c0_7, %c0_8], %21 {strides = array<i32>} : memref<8x3xf32, #tpu.memory_space<vmem>>, vector<8x3xf32>,
    return
  }
  func.func @transform_0(%arg0: i32) -> (i32, i32) {
    %c0_i32 = arith.constant 0 : i32
    %c0_i32_0 = arith.constant 0 : i32
    return %arg0, %c0_i32 : i32, i32
  }
  func.func @transform_1(%arg0: i32) -> (i32, i32) {
    %c0_i32 = arith.constant 0 : i32
    %c0_i32_0 = arith.constant 0 : i32
    %c0_i32_1 = arith.constant 0 : i32
    return %c0_i32, %c0_i32_0 : i32, i32
  }
  func.func @transform_2(%arg0: i32) -> (i32, i32) {
    %c0_i32 = arith.constant 0 : i32
    %c0_i32_0 = arith.constant 0 : i32
    %c0_i32_1 = arith.constant 0 : i32
    return %c0_i32, %c0_i32_0 : i32, i32
  }
  func.func @transform_3(%arg0: i32) -> (i32, i32) {
    %c0_i32 = arith.constant 0 : i32
    %c0_i32_0 = arith.constant 0 : i32
    return %arg0, %c0_i32 : i32, i32
  }
}

</mosaic_0001>

<bundles_post_ra>
// kernel: tpu_custom_call.1
= control target key start
LH: loop header
LB: loop body
LE: loop exit
PB: predicated region body
PF: predicated region fallthrough
CT: control target
= control target key end

     0   :  { %v73_v0 = vmov 0   ;;  %v74_v2 = vmov 2   ;;  %v75_v3 = vmov 1   ;;  %vm56_vm0 = vcmask 23552   ;;  %s114_s0 = inlined_call_operand.vmem [shape: f32[8,3], index: 0, kind: input, shape index: {}]   ;;  %s115_s1 = inlined_call_operand.vmem [shape: f32[3,3], index: 1, kind: input, shape index: {}]   ;;  %s116_s2 = inlined_call_operand.vmem [shape: f32[1,3], index: 2, kind: input, shape index: {}]   ;;  %s117_s3 = inlined_call_operand.vmem [shape: f32[8,3], index: 3, kind: output, shape index: {}]  }
   0x1   :  { %69 = vset.pattern.permute.xlu0 %v73_v0  ;;  %v14_v1 = vld [vmem:[%s114_s0] sm:$0xff]  ;;  %71 = vset.pattern.permute.xlu1 %v74_v2 }
   0x2   :  { %25 = vperm.xlu0 %69, %v14_v1   ;;  %47 = vperm.xlu1 %71, %v14_v1   ;;  %v63_v4 = vld [vmem:[%s115_s1] ss:$0 sm:$0xff]  ;;  %v64_v8 = vld [vmem:[%s115_s1 + $0x1] ss:$0 sm:$0xff]  ;;  %v65_v9 = vld [vmem:[%s115_s1 + $0x2] ss:$0 sm:$0xff] }
   0x3   :  { %v62_v7 = vld [vmem:[%s116_s2] ss:$0 sm:$0xff] }
   0x6   :  { %70 = vset.pattern.permute.xlu0 %v75_v3 }
   0x7   :  { %36 = vperm.xlu0 %70, %v14_v1  }
   0xb   :  { %72 = vset.pattern.permute.xlu0 %v74_v2 }
  0x7d   :  { %v26_v5 = vpop.permute.xlu0 %25  ;;  %v48_v10 = vpop.permute.xlu1 %47 }
  0x7e   :  { %v32_v6 = vmul.f32 %v63_v4, %v26_v5  ;;  %v54_v14 = vmul.f32 %v65_v9, %v48_v10 }
  0x80   :  { %v33_v12 = vadd.f32 %v62_v7, %v32_v6 }
  0x82   :  { %v37_v11 = vpop.permute.xlu0 %36 }
  0x83   :  { %v43_v13 = vmul.f32 %v64_v8, %v37_v11 }
  0x85   :  { %v44_v15 = vadd.f32 %v43_v13, %v33_v12 }
  0x87   :  { %v55_v16 = vadd.f32 %v54_v14, %v44_v15 }
  0x89   :  { %57 = vst.msk [vmem:[%s117_s3] sm:$0xff] %vm56_vm0, %v55_v16 }

</bundles_post_ra>
